<compile_context>
chip_gen: v7x
topology: tpu7x:2x2x1
jax: 0.10.0
libtpu: 0.0.40
codegen_flags: <defaults>
</compile_context>

<pallas_src>
import functools

import numpy as np
import jax
import jax.numpy as jnp
from jax import lax
from jax.experimental import pallas as pl
from jax.experimental.pallas import tpu as pltpu


def _round_up(n, m):
    return ((n + m - 1) // m) * m


def _cdiv(a, b):
    return -(-a // b)


@functools.lru_cache(None)
def _vmem_limit_bytes():
    # ~3/4 of physical VMEM: ~96 MiB on v5e/v6e (128 MiB), ~48 MiB on v7x (64 MiB).
    try:
        cap = int(pltpu.get_tpu_info().vmem_capacity_bytes)
        return max(32 * 1024 * 1024, min(cap * 3 // 4, 96 * 1024 * 1024))
    except Exception:
        return 32 * 1024 * 1024


@functools.lru_cache(None)
def _lstm_batch_tile_default():
    # 256 fills the v6e/v7x 256-wide MXU M dim; 128 matches v5e's 128-wide MXU.
    try:
        kind = jax.devices()[0].device_kind.lower()
    except Exception:
        kind = ""
    return 128 if any(v in kind for v in ("v2", "v3", "v4", "v5")) else 256


@functools.lru_cache(None)
def _buffered_ok():
    # Probe pipeline_mode=pl.Buffered(1) (single-buffered resident weights).
    try:
        def k(x_ref, o_ref):
            o_ref[...] = x_ref[...]
        f = pl.pallas_call(
            k,
            out_shape=jax.ShapeDtypeStruct((8, 128), jnp.float32),
            grid=(2,),
            in_specs=[pl.BlockSpec((8, 128), lambda i: (0, 0),
                                   pipeline_mode=pl.Buffered(1))],
            out_specs=pl.BlockSpec((8, 128), lambda i: (0, 0)),
        )
        jax.block_until_ready(f(jnp.zeros((8, 128), jnp.float32)))
        return True
    except Exception:
        return False


def _cparams():
    return pltpu.CompilerParams(
        dimension_semantics=("parallel",),
        vmem_limit_bytes=_vmem_limit_bytes())


def _const_spec(shape):
    zeros = (0,) * len(shape)
    index_map = lambda i: zeros
    if _buffered_ok():
        return pl.BlockSpec(shape, index_map, pipeline_mode=pl.Buffered(1))
    return pl.BlockSpec(shape, index_map)


def _pick_tile(rows, max_tile):
    tile = min(max_tile, _round_up(rows, 8))
    # prefer >=2 grid steps so the 'parallel' axis feeds both v7x TensorCores
    if rows > 8 and _cdiv(rows, tile) < 2:
        tile = max(8, _round_up(_cdiv(rows, 2), 8))
    return tile


# ---------------------------------------------------------------------------
# Kernel 1: DE-SimplE scores = h_emb * r_emb * t_emb, emitted full-width (bf16).
# Packed table is component-major (6, num_node, emb_dim):
# [amp_w, freq_w, phi_w, amp_d, freq_d, phi_d]; static lanes carry
# (ent, 0, pi/2, 0, 0, 0) so one elementwise formula reproduces
# cat(ent_emb, temporal_emb). Component slices are leading-axis (free views).
# ---------------------------------------------------------------------------
def scores_kernel(htab_ref, ttab_ref, r_ref, wk_ref, dy_ref, out_ref):
    wk = wk_ref[...]          # (tile, 1)
    dy = dy_ref[...]          # (tile, 1)

    def de_emb(tab_ref):
        return (tab_ref[0] * jnp.sin(tab_ref[1] * wk + tab_ref[2])
                + tab_ref[3] * jnp.sin(tab_ref[4] * dy + tab_ref[5]))

    s = de_emb(htab_ref) * r_ref[...] * de_emb(ttab_ref)
    out_ref[...] = s.astype(out_ref.dtype)


def compute_scores(htab, ttab, r, wk, dy, emb_dim, max_tile=1024):
    E = r.shape[0]
    tile = _pick_tile(E, max_tile)
    row3 = lambda i: (0, i, 0)
    row2 = lambda i: (i, 0)
    return pl.pallas_call(
        scores_kernel,
        out_shape=jax.ShapeDtypeStruct((E, emb_dim), jnp.bfloat16),
        grid=(_cdiv(E, tile),),
        in_specs=[
            pl.BlockSpec((6, tile, emb_dim), row3),
            pl.BlockSpec((6, tile, emb_dim), row3),
            pl.BlockSpec((tile, emb_dim), row2),
            pl.BlockSpec((tile, 1), row2),
            pl.BlockSpec((tile, 1), row2),
        ],
        out_specs=pl.BlockSpec((tile, emb_dim), row2),
        compiler_params=_cparams(),
    )(htab, ttab, r, wk, dy)


# ---------------------------------------------------------------------------
# Kernel 2: batched LSTM over padded per-node edge sequences (src + dst groups
# stacked on the batch axis). Returns the hidden state at each row's last
# *valid* timestep (matching the per-group PyTorch calls). Input projection is
# hoisted out of the recurrence (computed in T-chunks into a bf16 scratch);
# the recurrence only does a bf16 h @ W_hh per step with f32 accumulation.
# ---------------------------------------------------------------------------
def lstm_kernel(seq_ref, len_ref, wih_ref, whh_ref, b_ref, out_ref, gx_ref, *, unroll):
    T, B, e_in = seq_ref.shape
    H = out_ref.shape[1]

    # Hoisted input projection, chunked along T to bound the f32 intermediate.
    wih = wih_ref[...]                 # bf16 (e_in, 4H)
    CH = min(T, 8)
    for t0 in range(0, T, CH):
        tc = min(CH, T - t0)
        blk = seq_ref[pl.ds(t0, tc)]   # (tc, B, e_in) bf16
        g = jnp.dot(blk.reshape(tc * B, e_in), wih,
                    preferred_element_type=jnp.float32) + b_ref[...]
        gx_ref[pl.ds(t0, tc)] = g.reshape(tc, B, 4 * H).astype(gx_ref.dtype)

    lens = len_ref[...]                # (B, 1) int32 valid lengths
    whh = whh_ref[...]                 # bf16 (H, 4H)

    def step(t, carry):
        h, c = carry
        gates = (gx_ref[t].astype(jnp.float32)
                 + jnp.dot(h.astype(whh.dtype), whh,
                           preferred_element_type=jnp.float32))
        i = jax.nn.sigmoid(gates[:, 0 * H:1 * H])
        f = jax.nn.sigmoid(gates[:, 1 * H:2 * H])
        g = jnp.tanh(gates[:, 2 * H:3 * H])
        o = jax.nn.sigmoid(gates[:, 3 * H:4 * H])
        c_new = f * c + i * g
        h_new = o * jnp.tanh(c_new)
        valid = t < lens               # freeze (h, c) once past last valid step
        return jnp.where(valid, h_new, h), jnp.where(valid, c_new, c)

    h0 = jnp.zeros((B, H), jnp.float32)
    c0 = jnp.zeros((B, H), jnp.float32)
    h, _ = lax.fori_loop(0, T, step, (h0, c0), unroll=unroll)
    out_ref[...] = h


def lstm_last_hidden(seq_tbe, lens_b1, wih, whh, b):
    T, B, e_in = seq_tbe.shape
    H = whh.shape[0]
    tile = _pick_tile(B, _lstm_batch_tile_default())

    # VMEM budget (matters on v7x's 64 MiB): bf16 gx scratch + double-buffered
    # bf16 seq block + out/len buffers + resident weights. Shrink tile if needed.
    # TODO(synk): for very long T also stream seq/gx via an inner time pipeline.
    budget = int(_vmem_limit_bytes() * 0.6)

    def vmem_need(t):
        return (T * t * 4 * H * 2            # gx scratch (bf16)
                + 2 * T * t * e_in * 2       # seq block, double-buffered (bf16)
                + 8 * t * 4 * H * 4          # f32 chunk intermediate (CH<=8)
                + 2 * t * H * 4              # out block, double-buffered (f32)
                + 2 * t * 4                  # len block
                + (e_in + H) * 4 * H * 2 + 4 * H * 4)   # resident weights/bias

    while tile > 8 and vmem_need(tile) > budget:
        tile = max(8, _round_up(tile // 2, 8))

    unroll = max(1, min(4, T))
    return pl.pallas_call(
        functools.partial(lstm_kernel, unroll=unroll),
        out_shape=jax.ShapeDtypeStruct((B, H), jnp.float32),
        grid=(_cdiv(B, tile),),
        in_specs=[
            pl.BlockSpec((T, tile, e_in), lambda i: (0, i, 0)),
            pl.BlockSpec((tile, 1), lambda i: (i, 0)),
            _const_spec((e_in, 4 * H)),
            _const_spec((H, 4 * H)),
            _const_spec((1, 4 * H)),
        ],
        out_specs=pl.BlockSpec((tile, H), lambda i: (i, 0)),
        scratch_shapes=[pltpu.VMEM((T, tile, 4 * H), jnp.bfloat16)],
        compiler_params=_cparams(),
    )(seq_tbe, lens_b1, wih, whh, b)


# ---------------------------------------------------------------------------
# Kernel 3: fused MLP head: [x,emb]@W1 (as two matmuls) -> LayerNorm -> ReLU
# -> (dropout = inference identity) -> out (128-lane padded store). Kept f32
# (K-starved: contraction dims are tiny, MXU time negligible).
# ---------------------------------------------------------------------------
def mlp_head_kernel(x_ref, emb_ref, w1x_ref, w1e_ref, b1_ref, g1_ref, be1_ref,
                    wo_ref, bo_ref, out_ref):
    y = (jnp.dot(x_ref[...], w1x_ref[...], preferred_element_type=jnp.float32)
         + jnp.dot(emb_ref[...], w1e_ref[...], preferred_element_type=jnp.float32)
         + b1_ref[...])
    mu = jnp.mean(y, axis=-1, keepdims=True)
    var = jnp.mean((y - mu) ** 2, axis=-1, keepdims=True)
    y = (y - mu) * lax.rsqrt(var + 1e-5) * g1_ref[...] + be1_ref[...]
    y = jnp.maximum(y, 0.0)
    # TODO(synk): nn.Dropout executed as inference-mode identity.
    out_ref[...] = (jnp.dot(y, wo_ref[...], preferred_element_type=jnp.float32)
                    + bo_ref[...])


def mlp_head(x, emb, w1x, w1e, b1, g1, be1, wo_pad, bo_pad, num_output, max_tile=512):
    N, d_x = x.shape
    d_e = emb.shape[1]
    n_hidden = w1x.shape[1]
    o_pad = wo_pad.shape[1]
    tile = _pick_tile(N, max_tile)
    row = lambda i: (i, 0)
    out = pl.pallas_call(
        mlp_head_kernel,
        out_shape=jax.ShapeDtypeStruct((N, o_pad), jnp.float32),
        grid=(_cdiv(N, tile),),
        in_specs=[
            pl.BlockSpec((tile, d_x), row),
            pl.BlockSpec((tile, d_e), row),
            _const_spec((d_x, n_hidden)),
            _const_spec((d_e, n_hidden)),
            _const_spec((1, n_hidden)),
            _const_spec((1, n_hidden)),
            _const_spec((1, n_hidden)),
            _const_spec((n_hidden, o_pad)),
            _const_spec((1, o_pad)),
        ],
        out_specs=pl.BlockSpec((tile, o_pad), row),
        compiler_params=_cparams(),
    )(x, emb, w1x, w1e, b1, g1, be1, wo_pad, bo_pad)
    return out[:, :num_output]


# ---------------------------------------------------------------------------
# Parameter init (deterministic, synthetic)
# ---------------------------------------------------------------------------
def xavier_uniform(key, shape):
    fan_out, fan_in = shape[0], shape[-1]
    bound = float(np.sqrt(6.0 / (fan_in + fan_out)))
    return jax.random.uniform(key, shape, jnp.float32, -bound, bound)


def init_params(key, num_node, num_edge_types, emb_dim, d_x, n_hidden, num_output):
    s_dim = int(0.36 * emb_dim)
    t_dim = emb_dim - s_dim
    H = emb_dim
    ks = jax.random.split(key, 16)
    p = {
        "ent_embs": xavier_uniform(ks[0], (num_node, s_dim)),
        "rel_embs": xavier_uniform(ks[1], (num_edge_types, emb_dim)),
        "w_freq": xavier_uniform(ks[2], (num_node, t_dim)),
        "d_freq": xavier_uniform(ks[3], (num_node, t_dim)),
        "w_phi": xavier_uniform(ks[4], (num_node, t_dim)),
        "d_phi": xavier_uniform(ks[5], (num_node, t_dim)),
        "w_amp": xavier_uniform(ks[6], (num_node, t_dim)),
        "d_amp": xavier_uniform(ks[7], (num_node, t_dim)),
        # LSTM (input_size=emb_dim, hidden_size=emb_dim); stored transposed for x @ W.
        "lstm_wih": xavier_uniform(ks[8], (emb_dim, 4 * H)),
        "lstm_whh": xavier_uniform(ks[9], (H, 4 * H)),
        "lstm_b": (xavier_uniform(ks[10], (1, 4 * H)) + xavier_uniform(ks[11], (1, 4 * H))),
        "fc1_b": jnp.zeros((1, n_hidden), jnp.float32),
        "ln1_g": jnp.ones((1, n_hidden), jnp.float32),
        "ln1_b": jnp.zeros((1, n_hidden), jnp.float32),
        "out_w": xavier_uniform(ks[13], (n_hidden, num_output)),
        "out_b": jnp.zeros((1, num_output), jnp.float32),
    }
    # fc1 split by input blocks (equivalent to the single Linear on [x, emb]).
    fc1_w = xavier_uniform(ks[12], (d_x + emb_dim, n_hidden))
    p["fc1_w_x"] = fc1_w[:d_x]
    p["fc1_w_e"] = fc1_w[d_x:]

    # Packed DE table, component-major (6, num_node, emb_dim): lanes reproduce
    # cat(ent_emb, w_amp*sin(w_freq*wk+w_phi) + d_amp*sin(d_freq*dy+d_phi))
    # with one elementwise formula (static lanes: amp=ent, freq=0, phi=pi/2).
    zero = jnp.zeros((num_node, s_dim), jnp.float32)
    halfpi = jnp.full((num_node, s_dim), np.float32(np.pi / 2.0))
    cat = lambda a, b: jnp.concatenate([a, b], axis=1)
    p["de_table"] = jnp.stack([
        cat(p["ent_embs"], p["w_amp"]),   # amp_w
        cat(zero, p["w_freq"]),           # freq_w
        cat(halfpi, p["w_phi"]),          # phi_w
        cat(zero, p["d_amp"]),            # amp_d
        cat(zero, p["d_freq"]),           # freq_d
        cat(zero, p["d_phi"]),            # phi_d
    ], axis=0)

    # Lane-dense output head: pad num_output columns up to a 128-lane store.
    o_pad = _round_up(num_output, 128)
    p["out_w_pad"] = jnp.zeros((n_hidden, o_pad), jnp.float32).at[:, :num_output].set(p["out_w"])
    p["out_b_pad"] = jnp.zeros((1, o_pad), jnp.float32).at[:, :num_output].set(p["out_b"])
    return p, s_dim, t_dim


# ---------------------------------------------------------------------------
# Host-side group building (reproduces edge.groupby('src'/'dst') ordering)
# ---------------------------------------------------------------------------
def build_groups(keys_np, num_nodes, t_max):
    idx = np.zeros((num_nodes, t_max), dtype=np.int32)
    lens = np.zeros((num_nodes,), dtype=np.int32)
    for e, k in enumerate(keys_np):
        idx[k, lens[k]] = e
        lens[k] += 1
    return idx, lens


# ---------------------------------------------------------------------------
# Full HetNet forward (gnn=None, n_layer=1, edge_index provided -> mask = all rows)
# ---------------------------------------------------------------------------
def hetnet_forward(params, x, heads, rels, tails, weeks, days,
                   src_idx, src_len, dst_idx, dst_len, emb_dim, num_output):
    E = heads.shape[0]
    N = x.shape[0]

    # One packed-table gather per endpoint (glue).
    # TODO(synk): in-kernel DMA gather of de_table rows (scalar-prefetched
    # heads/tails) would remove this extra HBM round trip on sparse graphs.
    htab = params["de_table"][:, heads, :]     # (6, E, emb_dim)
    ttab = params["de_table"][:, tails, :]
    r = params["rel_embs"][rels]               # (E, emb_dim)
    wk = weeks.reshape(E, 1).astype(jnp.float32)
    dy = days.reshape(E, 1).astype(jnp.float32)

    scores = compute_scores(htab, ttab, r, wk, dy, emb_dim)    # (E, emb_dim) bf16

    # src + dst per-node padded edge groups in ONE LSTM call, gathered time-major
    idx_bt = jnp.concatenate([src_idx, dst_idx], axis=0)       # (2N, T)
    lens_b1 = jnp.concatenate([src_len, dst_len], axis=0).reshape(-1, 1)
    seq = scores[idx_bt.T]                                     # (T, 2N, emb) bf16
    h_all = lstm_last_hidden(
        seq, lens_b1,
        params["lstm_wih"].astype(jnp.bfloat16),
        params["lstm_whh"].astype(jnp.bfloat16),
        params["lstm_b"])
    emb_src, emb_dst = h_all[:N], h_all[N:2 * N]
    len_src = src_len.reshape(-1, 1)
    len_dst = dst_len.reshape(-1, 1)
    # src groups write first, dst groups overwrite; nodes with no edges stay zero
    emb = jnp.where(len_dst > 0, emb_dst, jnp.where(len_src > 0, emb_src, 0.0))

    # TODO(synk): gnn=None branch; external GNN module (HGT) has no in-script definition.
    return mlp_head(x, emb, params["fc1_w_x"], params["fc1_w_e"], params["fc1_b"],
                    params["ln1_g"], params["ln1_b"],
                    params["out_w_pad"], params["out_b_pad"], num_output)


# ---------------------------------------------------------------------------
# Pure-JAX reference (mirrors the PyTorch forward, f32) for in-script check
# ---------------------------------------------------------------------------
def reference_forward(p, x, heads, rels, tails, weeks, days,
                      src_idx, src_len, dst_idx, dst_len, emb_dim, num_output):
    wk = weeks.reshape(-1, 1)
    dy = days.reshape(-1, 1)

    def time_emb(ents):
        return (p["w_amp"][ents] * jnp.sin(p["w_freq"][ents] * wk + p["w_phi"][ents])
                + p["d_amp"][ents] * jnp.sin(p["d_freq"][ents] * dy + p["d_phi"][ents]))

    h = jnp.concatenate([p["ent_embs"][heads], time_emb(heads)], axis=1)
    t = jnp.concatenate([p["ent_embs"][tails], time_emb(tails)], axis=1)
    scores = h * p["rel_embs"][rels] * t

    H = emb_dim
    wih, whh, b = p["lstm_wih"], p["lstm_whh"], p["lstm_b"][0]

    def lstm_last(seq):                        # (L, emb_dim), exact length
        def step(carry, x_t):
            h_, c_ = carry
            g_all = x_t @ wih + h_ @ whh + b
            i = jax.nn.sigmoid(g_all[0 * H:1 * H])
            f = jax.nn.sigmoid(g_all[1 * H:2 * H])
            g = jnp.tanh(g_all[2 * H:3 * H])
            o = jax.nn.sigmoid(g_all[3 * H:4 * H])
            c_n = f * c_ + i * g
            return (o * jnp.tanh(c_n), c_n), None
        (h_T, _), _ = lax.scan(step, (jnp.zeros(H), jnp.zeros(H)), seq)
        return h_T

    N = x.shape[0]
    emb = np.zeros((N, emb_dim), np.float32)
    src_idx_np, src_len_np = np.asarray(src_idx), np.asarray(src_len)
    dst_idx_np, dst_len_np = np.asarray(dst_idx), np.asarray(dst_len)
    for n in range(N):                         # edge.groupby('src')
        L = int(src_len_np[n])
        if L > 0:
            emb[n] = np.asarray(lstm_last(scores[src_idx_np[n, :L]]))
    for n in range(N):                         # edge.groupby('dst') overwrites
        L = int(dst_len_np[n])
        if L > 0:
            emb[n] = np.asarray(lstm_last(scores[dst_idx_np[n, :L]]))

    xcat = jnp.concatenate([x, jnp.asarray(emb)], axis=1)
    w1 = jnp.concatenate([p["fc1_w_x"], p["fc1_w_e"]], axis=0)
    y = xcat @ w1 + p["fc1_b"]
    mu = y.mean(-1, keepdims=True)
    var = ((y - mu) ** 2).mean(-1, keepdims=True)
    y = (y - mu) / jnp.sqrt(var + 1e-5) * p["ln1_g"] + p["ln1_b"]
    y = jnp.maximum(y, 0.0)
    return y @ p["out_w"] + p["out_b"]


if __name__ == "__main__":
    # small, forward-consistent sizes
    NUM_NODE = 8      # node_count (== rows of x)
    D_X = 16          # raw node feature dim
    EMB_DIM = 32      # emb_dim (s=11, t=21)
    NUM_EDGES = 16    # number of temporal edges / facts
    N_HIDDEN = 128
    NUM_OUTPUT = 2

    key = jax.random.PRNGKey(0)
    k_par, k_x, k_h, k_r, k_t, k_w, k_d = jax.random.split(key, 7)

    params, s_dim, t_dim = init_params(k_par, NUM_NODE, 4, EMB_DIM,
                                       D_X, N_HIDDEN, NUM_OUTPUT)

    x = jax.random.normal(k_x, (NUM_NODE, D_X), jnp.float32)
    heads = jax.random.randint(k_h, (NUM_EDGES,), 0, NUM_NODE, jnp.int32)
    rels = jax.random.randint(k_r, (NUM_EDGES,), 0, 4, jnp.int32)
    tails = jax.random.randint(k_t, (NUM_EDGES,), 0, NUM_NODE, jnp.int32)
    weeks = jax.random.uniform(k_w, (NUM_EDGES,), jnp.float32, 0.0, 52.0)
    days = jax.random.uniform(k_d, (NUM_EDGES,), jnp.float32, 0.0, 7.0)

    # edge DataFrame surrogate: src == heads, dst == tails
    heads_np = np.asarray(heads)
    tails_np = np.asarray(tails)
    t_max = max(int(np.bincount(heads_np, minlength=NUM_NODE).max()),
                int(np.bincount(tails_np, minlength=NUM_NODE).max()), 1)
    src_idx_np, src_len_np = build_groups(heads_np, NUM_NODE, t_max)
    dst_idx_np, dst_len_np = build_groups(tails_np, NUM_NODE, t_max)
    src_idx, src_len = jnp.asarray(src_idx_np), jnp.asarray(src_len_np)
    dst_idx, dst_len = jnp.asarray(dst_idx_np), jnp.asarray(dst_len_np)

    out = hetnet_forward(params, x, heads, rels, tails, weeks, days,
                         src_idx, src_len, dst_idx, dst_len, EMB_DIM, NUM_OUTPUT)
    out = jax.block_until_ready(out)
    assert out.shape == (NUM_NODE, NUM_OUTPUT)
    assert bool(jnp.all(jnp.isfinite(out)))

    ref = jax.block_until_ready(reference_forward(
        params, x, heads, rels, tails, weeks, days,
        src_idx, src_len, dst_idx, dst_len, EMB_DIM, NUM_OUTPUT))
    # tolerance loosened from 5e-3 to 1e-2: scores / LSTM seq / W_ih / W_hh are
    # bf16 MXU inputs (f32 accumulation) per the performance review.
    np.testing.assert_allclose(np.asarray(out), np.asarray(ref), rtol=1e-2, atol=1e-2)
    print("KERNEL_OK")
</pallas_src>

<mosaic_0001>
module attributes {stable_mosaic.version = 11 : i64} {
  func.func @scores_kernel(%arg0: i32, %arg1: memref<6x8x32xf32, #tpu.memory_space<vmem>>, %arg2: memref<6x8x32xf32, #tpu.memory_space<vmem>>, %arg3: memref<8x32xf32, #tpu.memory_space<vmem>>, %arg4: memref<8x1xf32, #tpu.memory_space<vmem>>, %arg5: memref<8x1xf32, #tpu.memory_space<vmem>>, %arg6: memref<8x32xbf16, #tpu.memory_space<vmem>>) attributes {dimension_semantics = [#tpu.dimension_semantics<parallel>], iteration_bounds = array<i64: 2>, scalar_prefetch = 0 : i64, scratch_operands = 0 : i64, tpu.core_type = #tpu.core_type<tc>, window_params = [{transform_indices = @transform_0, window_bounds = array<i64: 6, 8, 32>}, {transform_indices = @transform_1, window_bounds = array<i64: 6, 8, 32>}, {transform_indices = @transform_2, window_bounds = array<i64: 8, 32>}, {transform_indices = @transform_3, window_bounds = array<i64: 8, 1>}, {transform_indices = @transform_4, window_bounds = array<i64: 8, 1>}, {transform_indices = @transform_5, window_bounds = array<i64: 8, 32>}]} {
    %c0 = arith.constant 0 : index
    %c0_0 = arith.constant 0 : index
    %0 = vector.load %arg4[%c0, %c0_0] : memref<8x1xf32, #tpu.memory_space<vmem>>, vector<8x1xf32>
    %c0_1 = arith.constant 0 : index
    %c0_2 = arith.constant 0 : index
    %1 = vector.load %arg5[%c0_1, %c0_2] : memref<8x1xf32, #tpu.memory_space<vmem>>, vector<8x1xf32>
    %c0_3 = arith.constant 0 : index
    %c0_4 = arith.constant 0 : index
    %c0_5 = arith.constant 0 : index
    %2 = vector.load %arg1[%c0_3, %c0_4, %c0_5] : memref<6x8x32xf32, #tpu.memory_space<vmem>>, vector<1x8x32xf32>
    %3 = vector.shape_cast %2 : vector<1x8x32xf32> to vector<8x32xf32>
    %c1 = arith.constant 1 : index
    %c0_6 = arith.constant 0 : index
    %c0_7 = arith.constant 0 : index
    %4 = vector.load %arg1[%c1, %c0_6, %c0_7] : memref<6x8x32xf32, #tpu.memory_space<vmem>>, vector<1x8x32xf32>
    %5 = vector.shape_cast %4 : vector<1x8x32xf32> to vector<8x32xf32>
    %6 = vector.broadcast %0 : vector<8x1xf32> to vector<8x32xf32>
    %7 = arith.mulf %5, %6 : vector<8x32xf32>
    %c2 = arith.constant 2 : index
    %c0_8 = arith.constant 0 : index
    %c0_9 = arith.constant 0 : index
    %8 = vector.load %arg1[%c2, %c0_8, %c0_9] : memref<6x8x32xf32, #tpu.memory_space<vmem>>, vector<1x8x32xf32>
    %9 = vector.shape_cast %8 : vector<1x8x32xf32> to vector<8x32xf32>
    %10 = arith.addf %7, %9 : vector<8x32xf32>
    %11 = math.sin %10 : vector<8x32xf32>
    %12 = arith.mulf %3, %11 : vector<8x32xf32>
    %c3 = arith.constant 3 : index
    %c0_10 = arith.constant 0 : index
    %c0_11 = arith.constant 0 : index
    %13 = vector.load %arg1[%c3, %c0_10, %c0_11] : memref<6x8x32xf32, #tpu.memory_space<vmem>>, vector<1x8x32xf32>
    %14 = vector.shape_cast %13 : vector<1x8x32xf32> to vector<8x32xf32>
    %c4 = arith.constant 4 : index
    %c0_12 = arith.constant 0 : index
    %c0_13 = arith.constant 0 : index
    %15 = vector.load %arg1[%c4, %c0_12, %c0_13] : memref<6x8x32xf32, #tpu.memory_space<vmem>>, vector<1x8x32xf32>
    %16 = vector.shape_cast %15 : vector<1x8x32xf32> to vector<8x32xf32>
    %17 = vector.broadcast %1 : vector<8x1xf32> to vector<8x32xf32>
    %18 = arith.mulf %16, %17 : vector<8x32xf32>
    %c5 = arith.constant 5 : index
    %c0_14 = arith.constant 0 : index
    %c0_15 = arith.constant 0 : index
    %19 = vector.load %arg1[%c5, %c0_14, %c0_15] : memref<6x8x32xf32, #tpu.memory_space<vmem>>, vector<1x8x32xf32>
    %20 = vector.shape_cast %19 : vector<1x8x32xf32> to vector<8x32xf32>
    %21 = arith.addf %18, %20 : vector<8x32xf32>
    %22 = math.sin %21 : vector<8x32xf32>
    %23 = arith.mulf %14, %22 : vector<8x32xf32>
    %24 = arith.addf %12, %23 : vector<8x32xf32>
    %c0_16 = arith.constant 0 : index
    %c0_17 = arith.constant 0 : index
    %25 = vector.load %arg3[%c0_16, %c0_17] : memref<8x32xf32, #tpu.memory_space<vmem>>, vector<8x32xf32>
    %26 = arith.mulf %24, %25 : vector<8x32xf32>
    %c0_18 = arith.constant 0 : index
    %c0_19 = arith.constant 0 : index
    %c0_20 = arith.constant 0 : index
    %27 = vector.load %arg2[%c0_18, %c0_19, %c0_20] : memref<6x8x32xf32, #tpu.memory_space<vmem>>, vector<1x8x32xf32>
    %28 = vector.shape_cast %27 : vector<1x8x32xf32> to vector<8x32xf32>
    %c1_21 = arith.constant 1 : index
    %c0_22 = arith.constant 0 : index
    %c0_23 = arith.constant 0 : index
    %29 = vector.load %arg2[%c1_21, %c0_22, %c0_23] : memref<6x8x32xf32, #tpu.memory_space<vmem>>, vector<1x8x32xf32>
    %30 = vector.shape_cast %29 : vector<1x8x32xf32> to vector<8x32xf32>
    %31 = vector.broadcast %0 : vector<8x1xf32> to vector<8x32xf32>
    %32 = arith.mulf %30, %31 : vector<8x32xf32>
    %c2_24 = arith.constant 2 : index
    %c0_25 = arith.constant 0 : index
    %c0_26 = arith.constant 0 : index
    %33 = vector.load %arg2[%c2_24, %c0_25, %c0_26] : memref<6x8x32xf32, #tpu.memory_space<vmem>>, vector<1x8x32xf32>
    %34 = vector.shape_cast %33 : vector<1x8x32xf32> to vector<8x32xf32>
    %35 = arith.addf %32, %34 : vector<8x32xf32>
    %36 = math.sin %35 : vector<8x32xf32>
    %37 = arith.mulf %28, %36 : vector<8x32xf32>
    %c3_27 = arith.constant 3 : index
    %c0_28 = arith.constant 0 : index
    %c0_29 = arith.constant 0 : index
    %38 = vector.load %arg2[%c3_27, %c0_28, %c0_29] : memref<6x8x32xf32, #tpu.memory_space<vmem>>, vector<1x8x32xf32>
    %39 = vector.shape_cast %38 : vector<1x8x32xf32> to vector<8x32xf32>
    %c4_30 = arith.constant 4 : index
    %c0_31 = arith.constant 0 : index
    %c0_32 = arith.constant 0 : index
    %40 = vector.load %arg2[%c4_30, %c0_31, %c0_32] : memref<6x8x32xf32, #tpu.memory_space<vmem>>, vector<1x8x32xf32>
    %41 = vector.shape_cast %40 : vector<1x8x32xf32> to vector<8x32xf32>
    %42 = vector.broadcast %1 : vector<8x1xf32> to vector<8x32xf32>
    %43 = arith.mulf %41, %42 : vector<8x32xf32>
    %c5_33 = arith.constant 5 : index
    %c0_34 = arith.constant 0 : index
    %c0_35 = arith.constant 0 : index
    %44 = vector.load %arg2[%c5_33, %c0_34, %c0_35] : memref<6x8x32xf32, #tpu.memory_space<vmem>>, vector<1x8x32xf32>
    %45 = vector.shape_cast %44 : vector<1x8x32xf32> to vector<8x32xf32>
    %46 = arith.addf %43, %45 : vector<8x32xf32>
    %47 = math.sin %46 : vector<8x32xf32>
    %48 = arith.mulf %39, %47 : vector<8x32xf32>
    %49 = arith.addf %37, %48 : vector<8x32xf32>
    %50 = arith.mulf %26, %49 : vector<8x32xf32>
    %51 = arith.truncf %50 : vector<8x32xf32> to vector<8x32xbf16>
    %c0_36 = arith.constant 0 : index
    %c0_37 = arith.constant 0 : index
    %52 = vector.load %arg6[%c0_36, %c0_37] : memref<8x32xbf16, #tpu.memory_space<vmem>>, vector<8x32xbf16>
    tpu.vector_store %arg6[%c0_36, %c0_37], %51 {strides = array<i32>} : memref<8x32xbf16, #tpu.memory_space<vmem>>, vector<8x32xbf16>,
    return
  }
  func.func @transform_0(%arg0: i32) -> (i32, i32, i32) {
    %c0_i32 = arith.constant 0 : i32
    %c0_i32_0 = arith.constant 0 : i32
    %c0_i32_1 = arith.constant 0 : i32
    return %c0_i32, %arg0, %c0_i32_0 : i32, i32, i32
  }
  func.func @transform_1(%arg0: i32) -> (i32, i32, i32) {
    %c0_i32 = arith.constant 0 : i32
    %c0_i32_0 = arith.constant 0 : i32
    %c0_i32_1 = arith.constant 0 : i32
    return %c0_i32, %arg0, %c0_i32_0 : i32, i32, i32
  }
  func.func @transform_2(%arg0: i32) -> (i32, i32) {
    %c0_i32 = arith.constant 0 : i32
    %c0_i32_0 = arith.constant 0 : i32
    return %arg0, %c0_i32 : i32, i32
  }
  func.func @transform_3(%arg0: i32) -> (i32, i32) {
    %c0_i32 = arith.constant 0 : i32
    %c0_i32_0 = arith.constant 0 : i32
    return %arg0, %c0_i32 : i32, i32
  }
  func.func @transform_4(%arg0: i32) -> (i32, i32) {
    %c0_i32 = arith.constant 0 : i32
    %c0_i32_0 = arith.constant 0 : i32
    return %arg0, %c0_i32 : i32, i32
  }
  func.func @transform_5(%arg0: i32) -> (i32, i32) {
    %c0_i32 = arith.constant 0 : i32
    %c0_i32_0 = arith.constant 0 : i32
    return %arg0, %c0_i32 : i32, i32
  }
}

</mosaic_0001>

<bundles_post_ra>
// kernel: tpu_custom_call.1
= control target key start
LH: loop header
LB: loop body
LE: loop exit
PB: predicated region body
PF: predicated region fallthrough
CT: control target
= control target key end

     0   :  { %s1776_s0 = inlined_call_operand.hbm [shape: f32[6,16,32], index: 0, kind: input, shape index: {}]   ;;  %s1777_s1 = inlined_call_operand.hbm [shape: f32[6,16,32], index: 1, kind: input, shape index: {}]   ;;  %s1778_s2 = inlined_call_operand.vmem [shape: f32[16,32], index: 2, kind: input, shape index: {}]   ;;  %s1779_s3 = inlined_call_operand.vmem [shape: f32[16,1], index: 3, kind: input, shape index: {}]   ;;  %s1780_s4 = inlined_call_operand.vmem [shape: f32[16,1], index: 4, kind: input, shape index: {}]   ;;  %s1781_s5 = inlined_call_operand.hbm [shape: bf16[16,32], index: 5, kind: output, shape index: {}]  }
   0x1   :  { %1785 = sst [smem:[#allocation11_spill]] %s1776_s0 }
   0x2   :  { %10 = vsyncpa [#allocation3], 0 }
   0x3   :  { %12 = vsyncpa [#allocation3 + $0x1], 0 }
   0x4   :  { %13 = vsyncpa [#allocation6], 0 }
   0x5   :  { %15 = vsyncpa [#allocation6 + $0x1], 0 }
   0x6   :  { %16 = vsyncpa [#allocation4], 0 }
   0x7   :  { %18 = vsyncpa [#allocation4 + $0x1], 0  ;;  %s1257_s18 = smov 0   ;;  %s1259_s19 = smov 0  }
   0x8   :  { %s1261_s20 = smov 0   ;;  %s1263_s21 = smov 0  }
   0x9 LB: > { %s1278_s22 = sadd.s32 4294967295, %s1212_s21   ;;  %s945_s23 = sadd.s32 4294967294, %s1212_s21   ;;  %s1212_s21 = sphi %s1263_s21, %s1807_s21   ;;  %s1208_s20 = sphi %s1261_s20, %s1806_s20   ;;  %s1204_s19 = sphi %s1259_s19, %s1805_s19   ;;  %s1200_s18 = sphi %s1257_s18, %s1804_s18  }
   0xa   : > { %s1282_s24 = sadd.s32 1, %s1212_s21   ;;  %s31_s25 = sadd.s32 1, %s1208_s20 }
   0xb   : > { %s28_s26 = ssub.s32 %s1212_s21, %s1282_s24  ;;  %p38_p0 = scmp.ne.s32.totalorder %s1208_s20, %s1204_s19 }
   0xc   : > { %p29_p1 = scmp.eq.s32.totalorder %s28_s26, 0  ;;  %p39_p2 = scmp.eq.s32.totalorder %s1212_s21, 0 }
   0xd   : > { %p44_p3 = scmp.ne.s32.totalorder %s1204_s19, %s1200_s18  ;;  %p45_p4 = scmp.eq.s32.totalorder %s1278_s22, 0 }
   0xe   : > { %s1294_s27 = scalar_select %p29_p1, %s1208_s20, %s31_s25  }
   0xf   : > { %p40_p5 = por %p39_p2, %p38_p0  ;;  %p1296_p6 = por %p45_p4, %p44_p3 }
  0x10   : > { %p172_p7 = scmp.eq.s32.totalorder %s1278_s22, 1  ;;  %p178_p8 = scmp.eq.s32.totalorder %s945_s23, 1 }
  0x11   : > { %s1786_s28 = scalar_select %p1296_p6, 1, 0 }
  0x12   : > { %p1021_p10 = scmp.lt.s32.totalorder %s1212_s21, 2  ;;  %p1303_p11 = por %p172_p7, %p38_p0 }
  0x13   : > { %p1307_p12 = por %p178_p8, %p44_p3  ;;  %s1312_s6 = sand.u32 1, %s1208_s20  }
  0x14   : > { %s1787_s29 = scalar_select %p1303_p11, 1, 0 }
  0x15   : > { %s1788_s30 = scalar_select %p1307_p12, 1, 0 }
  0x16   : > { %s948_s7 = sshll.u32 %s1212_s21, 7  ;;  %s985_s8 = smul.u32 48, %s1312_s6 }
  0x17   : > { %s1789_s0 = sld [smem:[#allocation11_spill]]  ;;  %p1323_p13 = pnand %p1021_p10, %p40_p5 }
  0x18   : > { %s202_s13 = scalar_lea.vmem [#allocation2], %s985_s8  ;;  %s199_s15 = scalar_lea.sflag [#allocation3], %s1312_s6 }
  0x19   : > { %s208_s14 = sshll.u32 %s202_s13, 4  ;;  %p1084_p2 = pneg %p1323_p13  ;;  %s1329_s14 = int_to_ptr.vmem [resolvable:$true] %s208_s14 }
  0x1d   : > { %s1321_s11 = scalar_lea.hbm %s1789_s0, %s948_s7  ;;  %s1087_s25 = scalar_lea.hbm %s1789_s0, 1536 }
  0x1e   : > { %s1082_s16 = scalar_lea.hbm %s1321_s11, 768  ;;  %p1088_p5 = scmp.lt.u32.totalorder %s1321_s11, %s1789_s0 }
  0x1f   : > { %p1083_p1 = scmp.ne.s32.totalorder %s1321_s11, %s1082_s16  ;;  %p1089_p7 = scmp.lt.u32.totalorder %s1087_s25, %s1082_s16 }
  0x20   : > { %p1091_p10 = scmp.lt.u32.totalorder %s1082_s16, %s1321_s11 }
  0x21   : > { %p1085_p3 = pnand %p1084_p2, %p1083_p1  ;;  %p1090_p8 = por %p1089_p7, %p1088_p5 }
  0x23   : > { %p1086_p4 = pneg %p1085_p3  ;;  %p1092_p9 = por %p1091_p10, %p1090_p8 }
  0x25   : > { %p1093_p0 = pnand %p1092_p9, %p1086_p4 }
  0x27   : > { %1096 = shalt.err (!%p1093_p0)
}
  0x28   : > { %s1097_s10 = scalar_lea.vmem %s1329_s14, 768  ;;  %s1214_s13 = smov [#allocation2]  }
  0x29   : > { %p1098_p1 = scmp.ne.s32.totalorder %s1329_s14, %s1097_s10  ;;  %s1102_s17 = sshll.u32 %s1214_s13, 4  ;;  %s1103_s17 = int_to_ptr.vmem [resolvable:$false] %s1102_s17 }
  0x2a   : > { %s1104_s23 = scalar_lea.vmem %s1103_s17, 1536  ;;  %p1105_p11 = scmp.lt.s32.totalorder %s1329_s14, %s1103_s17 }
  0x2b   : > { %p1100_p3 = pnand %p1098_p1, %p1084_p2  ;;  %p1106_p5 = scmp.lt.s32.totalorder %s1104_s23, %s1097_s10 }
  0x2d   : > { %p1101_p12 = pneg %p1100_p3  ;;  %p1107_p7 = por %p1106_p5, %p1105_p11 }
  0x2f   : > { %p1108_p8 = pnand %p1107_p7, %p1101_p12 }
  0x31   : > { %1111 = shalt.err (!%p1108_p8)
}
  0x32   : > { %s1783_s16 = smov 256   ;;  %s1216_s25 = smov 128  }
  0x33   : > { %s1217_s26 = smov 8   ;;  %p257_p9 = scmp.lt.s32.totalorder %s1212_s21, 3 }
  0x34   : > { %1013 = dma.hbm_to_vmem [thread:$0]  (!%p1323_p13), %s1321_s11, 768, %s1329_s14, %s199_s15, %s1783_s16, %s1216_s25, %s1217_s26  }
  0x35   : > { %s1369_s13 = scalar_lea.hbm %s1777_s1, %s948_s7  ;;  %p1791_p11 = scmp.ge.s32.totalorder %s1212_s21, 1 }
  0x36   : > { %s222_s23 = scalar_lea.vmem [#allocation5], %s985_s8  ;;  %s219_s11 = scalar_lea.sflag [#allocation6], %s1312_s6 }
  0x37   : > { %p1373_p12 = pnand %p1791_p11, %p257_p9  ;;  %s228_s0 = sshll.u32 %s222_s23, 4  ;;  %s1379_s0 = int_to_ptr.vmem [resolvable:$true] %s228_s0 }
  0x38   : > { %s1112_s14 = scalar_lea.hbm %s1369_s13, 768  ;;  %s1117_s9 = scalar_lea.hbm %s1777_s1, 1536 }
  0x39   : > { %p1113_p0 = scmp.ne.s32.totalorder %s1369_s13, %s1112_s14  ;;  %p1118_p1 = scmp.lt.u32.totalorder %s1369_s13, %s1777_s1 }
  0x3a   : > { %p1119_p3 = scmp.lt.u32.totalorder %s1117_s9, %s1112_s14  ;;  %p1121_p7 = scmp.lt.u32.totalorder %s1112_s14, %s1369_s13 }
  0x3b   : > { %p1115_p4 = pnand %p1113_p0, %p1084_p2 }
  0x3c   : > { %p1120_p5 = por %p1119_p3, %p1118_p1 }
  0x3d   : > { %p1116_p10 = pneg %p1115_p4 }
  0x3e   : > { %p1122_p8 = por %p1121_p7, %p1120_p5 }
  0x40   : > { %p1123_p9 = pnand %p1122_p8, %p1116_p10 }
  0x42   : > { %1126 = shalt.err (!%p1123_p9)
}
  0x43   : > { %s1127_s8 = scalar_lea.vmem %s1379_s0, 768  ;;  %s1218_s23 = smov [#allocation5]  }
  0x44   : > { %p1128_p11 = scmp.ne.s32.totalorder %s1379_s0, %s1127_s8  ;;  %s1132_s7 = sshll.u32 %s1218_s23, 4  ;;  %s1133_s7 = int_to_ptr.vmem [resolvable:$false] %s1132_s7 }
  0x45   : > { %s1134_s16 = scalar_lea.vmem %s1133_s7, 1536  ;;  %p1135_p6 = scmp.lt.s32.totalorder %s1379_s0, %s1133_s7 }
  0x46   : > { %p1130_p0 = pnand %p1128_p11, %p1084_p2  ;;  %p1136_p1 = scmp.lt.s32.totalorder %s1134_s16, %s1127_s8 }
  0x48   : > { %p1131_p4 = pneg %p1130_p0  ;;  %p1137_p3 = por %p1136_p1, %p1135_p6 }
  0x4a   : > { %p1138_p5 = pnand %p1137_p3, %p1131_p4 }
  0x4c   : > { %1141 = shalt.err (!%p1138_p5)
}
  0x4d   : > { %s1793_s14 = smov 256   ;;  %261 = sbr.rel (%p1373_p12) target bundleno = 385 (0x181), region = 40 }
  0x4e   : > { %1016 = dma.hbm_to_vmem [thread:$0]  (!%p1323_p13), %s1369_s13, 768, %s1379_s0, %s219_s11, %s1793_s14, %s1216_s25, %s1217_s26  }
  0x4f   : > { %s1413_s15 = sand.u32 (!%p1373_p12), 1, %s1204_s19   ;;  %p1794_p6 = scmp.ne.s32.totalorder (!%p1373_p12), %s1786_s28, 0 }
  0x50   : > { %s987_s9 = smul.u32 (!%p1373_p12), 48, %s1413_s15  ;;  %s264_s10 = scalar_lea.sflag (!%p1373_p12), [#allocation3], %s1413_s15 }
  0x52   : > { %s1417_s12 = scalar_lea.vmem (!%p1373_p12), [#allocation2], %s987_s9 }
  0x54   : > { %1187 = dma.done.wait (%p1794_p6), %s264_s10, 768  }
  0x55   : > { %1189 = vsyncadd (%p1794_p6), %s264_s10, 4294966528  ;;  %s273_s0 = scalar_lea.sflag [#allocation6], %s1413_s15  ;;  %s1424_s6 = scalar_lea.vmem [#allocation5], %s987_s9 }
  0x56   : > { %1191 = dma.done.wait (%p1794_p6), %s273_s0, 768  }
  0x57   : > { %1193 = vsyncadd (%p1794_p6), %s273_s0, 4294966528  ;;  %p320_p13 = scmp.lt.s32.totalorder %s1278_s22, 1  ;;  %v1219_v0 = vmov 0   ;;  %v955_v3 = vld [vmem:[%s1417_s12 + $0x8] sm:$0xff]  ;;  %v956_v6 = vld [vmem:[%s1417_s12 + $0x10] sm:$0xff]  ;;  %s951_s9 = sshll.u32 %s1413_s15, 2 }
  0x58   : > { %1065 = vset.pattern.permute.xlu0 %v1219_v0  ;;  %v968_v4 = vld [vmem:[%s1424_s6 + $0x8] sm:$0xff]  ;;  %v969_v7 = vld [vmem:[%s1424_s6 + $0x10] sm:$0xff]  ;;  %v962_v11 = vld [vmem:[%s1417_s12 + $0x20] sm:$0xff]  ;;  %v1220_v40 = vmov 683565275   ;;  %s982_s10 = sshll.u32 %s1278_s22, 6 }
  0x59   : > { %s321_s25 = scalar_select %p320_p13, %s1278_s22, 1  ;;  %v963_v16 = vld [vmem:[%s1417_s12 + $0x28] sm:$0xff]  ;;  %v1221_v42 = vmov 2475754826   ;;  %v1222_v45 = vmov 2131351028  }
  0x5a   : > { %v1223_v47 = vmov 2102212464   ;;  %v1224_v49 = vmov 920167782   ;;  %v1225_v56 = vmov 1326507024  }
  0x5b   : > { %s1432_s26 = sshll.u32 %s321_s25, 3  ;;  %s803_s13 = scalar_lea.sflag [#allocation4], %s1413_s15 }
  0x5c   : > { %s327_s28 = scalar_lea.vmem %s1779_s3, %s1432_s26  ;;  %s331_s23 = scalar_lea.vmem %s1780_s4, %s1432_s26 }
  0x5d   : > { %v332_v1 = vld [vmem:[%s327_s28] sm:$0xff]  ;;  %s323_s14 = scalar_lea.vmem %s1778_s2, %s1432_s26  ;;  %s1732_s26 = scalar_lea.hbm %s1781_s5, %s982_s10 }
  0x5e   : > { %339 = vperm.xlu0 %1065, %v332_v1   ;;  %v333_v2 = vld [vmem:[%s331_s23] sm:$0xff]  ;;  %p1801_p12 = scmp.ne.s32.totalorder %s1787_s29, 0  ;;  %s1226_s22 = smov [#allocation7]  }
  0x5f   : > { %s1146_s28 = sshll.u32 %s1226_s22, 4  ;;  %s1147_s28 = int_to_ptr.vmem [resolvable:$false] %s1146_s28 }
  0x60   : > { %s1148_s11 = scalar_lea.vmem %s1147_s28, 128 }
  0x62   : > { %457 = vperm.xlu0 %1065, %v333_v2  }
  0xdd   : > { %v340_v5 = vpop.permute.xlu0 %339 }
  0xde   : > { %v342_v8 = vmul.f32 %v955_v3, %v340_v5  ;;  %v575_v9 = vmul.f32 %v968_v4, %v340_v5 }
  0xe0   : > { %v1446_v10 = vadd.f32 %v956_v6, %v342_v8  ;;  %v1449_v12 = vadd.f32 %v969_v7, %v575_v9 }
  0xe1   : > { %v1451_v13 = vpop.permute.xlu0 %457 }
  0xe2   : > { %v346_v14 = vand.u32 2147483647, %v1446_v10  ;;  %v349_v15 = vand.u32 2139095040, %v1446_v10  ;;  %v460_v17 = vmul.f32 %v962_v11, %v1451_v13  ;;  %v582_v18 = vand.u32 2139095040, %v1449_v12 }
  0xe3   : > { %v579_v38 = vand.u32 2147483647, %v1449_v12 }
  0xe4   : > { %v350_v19 = vshrl.u32 %v349_v15, 23  ;;  %v353_v20 = vand.u32 8388607, %v346_v14  ;;  %v1460_v21 = vadd.f32 %v963_v16, %v460_v17  ;;  %v583_v22 = vshrl.u32 %v582_v18, 23 }
  0xe6   : > { %v957_v23 = vadd.s32 4294967169, %v350_v19  ;;  %v464_v24 = vand.u32 2147483647, %v1460_v21  ;;  %v467_v25 = vand.u32 2139095040, %v1460_v21  ;;  %v970_v27 = vadd.s32 4294967169, %v583_v22 }
  0xe7   : > { %v354_v28 = vor.u32 8388608, %v353_v20 }
  0xe8   : > { %v356_v26 = vadd.s32 1, %v957_v23  ;;  %v468_v29 = vshrl.u32 %v467_v25, 23  ;;  %v471_v30 = vand.u32 8388607, %v464_v24  ;;  %v589_v31 = vadd.s32 1, %v970_v27 }
  0xe9   : > { %v1466_v36 = vshll.u32 %v354_v28, 8 }
  0xea   : > { %vm357_vm0 = vcmp.gt.s32.totalorder %v356_v26, 0  ;;  %v964_v33 = vadd.s32 4294967169, %v468_v29  ;;  %v472_v37 = vor.u32 8388608, %v471_v30  ;;  %vm590_vm1 = vcmp.gt.s32.totalorder %v589_v31, 0 }
  0xeb   : > { %v358_v32 = vsel %vm357_vm0, %v356_v26, 0  ;;  %v591_v19 = vsel %vm590_vm1, %v589_v31, 0 }
  0xec   : > { %v359_v34 = vshrl.u32 %v358_v32, 5  ;;  %v360_v35 = vand.u32 31, %v358_v32  ;;  %v474_v44 = vadd.s32 1, %v964_v33  ;;  %v1489_v18 = vshll.u32 %v472_v37, 8 }
  0xee   : > { %v361_v39 = vsub.s32 32, %v360_v35  ;;  %v363_v41 = vshll.u32 %v1220_v40, %v360_v35  ;;  %v366_v43 = vshll.u32 %v1221_v42, %v360_v35  ;;  %v369_v46 = vshll.u32 %v1222_v45, %v360_v35 }
  0xef   : > { %v372_v48 = vshll.u32 %v1223_v47, %v360_v35  ;;  %v375_v50 = vshll.u32 %v1224_v49, %v360_v35  ;;  %vm378_vm2 = vcmp.lt.s32.totalorder %v359_v34, 1  ;;  %vm379_vm3 = vcmp.lt.s32.totalorder %v359_v34, 2 }
  0xf0   : > { %v364_v51 = vshrl.u32 %v1221_v42, %v361_v39  ;;  %v367_v52 = vshrl.u32 %v1222_v45, %v361_v39  ;;  %v370_v53 = vshrl.u32 %v1223_v47, %v361_v39  ;;  %v362_v54 = vshrl.u32 %v1220_v40, %v361_v39 }
  0xf1   : > { %v373_v55 = vshrl.u32 %v1224_v49, %v361_v39  ;;  %v376_v57 = vshrl.u32 %v1225_v56, %v361_v39  ;;  %vm380_vm4 = vcmp.lt.s32.totalorder %v359_v34, 3  ;;  %vm475_vm5 = vcmp.gt.s32.totalorder %v474_v44, 0 }
  0xf2   : > { %v365_v58 = vor.u32 %v364_v51, %v363_v41  ;;  %v368_v59 = vor.u32 %v367_v52, %v366_v43  ;;  %v371_v60 = vor.u32 %v370_v53, %v369_v46  ;;  %vm381_vm6 = vcmp.lt.s32.totalorder %v359_v34, 4 }
  0xf3   : > { %v374_v61 = vor.u32 %v373_v55, %v372_v48  ;;  %v377_v62 = vor.u32 %v376_v57, %v375_v50  ;;  %v476_v63 = vsel %vm475_vm5, %v474_v44, 0  ;;  %v593_v51 = vand.u32 31, %v591_v19 }
  0xf4   : > { %v382_v0 = vsel %vm378_vm2, %v362_v54, %v365_v58  ;;  %v383_v1 = vsel %vm381_vm6, %v371_v60, 2102212464  ;;  %v386_v2 = vsel %vm378_vm2, %v365_v58, %v368_v59  ;;  %v390_v3 = vsel %vm378_vm2, %v368_v59, %v371_v60 }
  0xf5   : > { %v384_v4 = vsel %vm380_vm4, %v368_v59, %v383_v1  ;;  %v387_v5 = vsel %vm381_vm6, %v374_v61, 920167782  ;;  %v391_v6 = vsel %vm381_vm6, %v377_v62, 1326507024  ;;  %v477_v7 = vshrl.u32 %v476_v63, 5 }
  0xf6   : > { %v385_v8 = vsel %vm379_vm3, %v382_v0, %v384_v4  ;;  %v388_v9 = vsel %vm380_vm4, %v371_v60, %v387_v5  ;;  %v392_v11 = vsel %vm380_vm4, %v374_v61, %v391_v6  ;;  %v478_v15 = vand.u32 31, %v476_v63 }
  0xf7   : > { %v389_v16 = vsel %vm379_vm3, %v386_v2, %v388_v9  ;;  %v393_v17 = vsel %vm379_vm3, %v390_v3, %v392_v11  ;;  %v401_v26 = vmul.u32 %v1466_v36, %v385_v8  ;;  %vm496_vm7 = vcmp.lt.s32.totalorder %v477_v7, 1  ;;  %v975_v9 = vld [vmem:[%s1424_s6 + $0x20] sm:$0xff] }
  0xf8   : > { %v1493_v20 = vmul.u32.u64.low %v1466_v36, %v393_v17  ;;  %v1494_v22 = vmul.u32.u64.high %v1466_v36, %v393_v17, %v1493_v20  ;;  %v1497_v23 = vmul.u32.u64.low %v1466_v36, %v389_v16  ;;  %v1498_v25 = vmul.u32.u64.high %v1466_v36, %v389_v16, %v1497_v23 }
  0xf9   : > { %v479_v27 = vsub.s32 32, %v478_v15  ;;  %v481_v28 = vshll.u32 %v1220_v40, %v478_v15  ;;  %v484_v29 = vshll.u32 %v1221_v42, %v478_v15  ;;  %v487_v30 = vshll.u32 %v1222_v45, %v478_v15 }
  0xfa   : > { %v490_v31 = vshll.u32 %v1223_v47, %v478_v15  ;;  %v493_v32 = vshll.u32 %v1224_v49, %v478_v15  ;;  %vm497_vm8 = vcmp.lt.s32.totalorder %v477_v7, 2  ;;  %vm403_vm9 = vc.u32 %v1494_v22, %v1497_v23 }
  0xfb   : > { %v482_v33 = vshrl.u32 %v1221_v42, %v479_v27  ;;  %v485_v34 = vshrl.u32 %v1222_v45, %v479_v27  ;;  %v488_v35 = vshrl.u32 %v1223_v47, %v479_v27  ;;  %v404_v36 = vadd.s32 1, %v1498_v25 }
  0xfc   : > { %v480_v37 = vshrl.u32 %v1220_v40, %v479_v27  ;;  %v491_v39 = vshrl.u32 %v1224_v49, %v479_v27  ;;  %v494_v46 = vshrl.u32 %v1225_v56, %v479_v27  ;;  %vm499_vm10 = vcmp.lt.s32.totalorder %v477_v7, 4 }
  0xfd   : > { %v483_v41 = vor.u32 %v482_v33, %v481_v28  ;;  %v486_v43 = vor.u32 %v485_v34, %v484_v29  ;;  %v489_v44 = vor.u32 %v488_v35, %v487_v30  ;;  %v405_v48 = vsel %vm403_vm9, %v404_v36, %v1498_v25 }
  0xfe   : > { %v492_v50 = vor.u32 %v491_v39, %v490_v31  ;;  %v406_v52 = vadd.s32 %v405_v48, %v401_v26  ;;  %v495_v53 = vor.u32 %v494_v46, %v493_v32  ;;  %vm498_vm11 = vcmp.lt.s32.totalorder %v477_v7, 3  ;;  %v976_v39 = vld [vmem:[%s1424_s6 + $0x28] sm:$0xff] }
  0xff   : > { %v501_v54 = vsel %vm499_vm10, %v489_v44, 2102212464  ;;  %v500_v55 = vsel %vm496_vm7, %v480_v37, %v483_v41  ;;  %v504_v57 = vsel %vm496_vm7, %v483_v41, %v486_v43  ;;  %v508_v59 = vsel %vm496_vm7, %v486_v43, %v489_v44 }
 0x100   : > { %v505_v58 = vsel %vm499_vm10, %v492_v50, 920167782  ;;  %v407_v60 = vadd.s32 536870912, %v406_v52  ;;  %v502_v61 = vsel %vm498_vm11, %v486_v43, %v501_v54  ;;  %v509_v63 = vsel %vm499_vm10, %v495_v53, 1326507024 }
 0x101   : > { %v506_v62 = vsel %vm498_vm11, %v489_v44, %v505_v58  ;;  %v510_v1 = vsel %vm498_vm11, %v492_v50, %v509_v63  ;;  %v586_v2 = vand.u32 8388607, %v579_v38  ;;  %v594_v3 = vsub.s32 32, %v593_v51 }
 0x102   : > { %v507_v0 = vsel %vm497_vm8, %v504_v57, %v506_v62  ;;  %v1523_v4 = vshrl.u32 %v407_v60, 30  ;;  %v511_v5 = vsel %vm497_vm8, %v508_v59, %v510_v1  ;;  %v503_v11 = vsel %vm497_vm8, %v500_v55, %v502_v61 }
 0x103   : > { %v1527_v6 = vmul.u32.u64.low %v1489_v18, %v507_v0  ;;  %v1528_v8 = vmul.u32.u64.high %v1489_v18, %v507_v0, %v1527_v6  ;;  %v1534_v15 = vmul.u32.u64.low %v1489_v18, %v511_v5  ;;  %v1535_v16 = vmul.u32.u64.high %v1489_v18, %v511_v5, %v1534_v15 }
 0x104   : > { %v409_v17 = vshll.u32 %v1523_v4, 30  ;;  %v587_v20 = vor.u32 8388608, %v586_v2  ;;  %v1538_v25 = vshrl.u32 %v591_v19, 5  ;;  %v688_v26 = vmul.f32 %v975_v9, %v1451_v13 }
 0x105   : > { %v519_v28 = vmul.u32 %v1489_v18, %v503_v11  ;;  %v522_v29 = vadd.s32 1, %v1528_v8  ;;  %v597_v7 = vshrl.u32 %v1221_v42, %v594_v3  ;;  %vm521_vm12 = vc.u32 %v1535_v16, %v1527_v6 }
 0x106   : > { %v410_v27 = vsub.s32 %v406_v52, %v409_v17  ;;  %v596_v30 = vshll.u32 %v1220_v40, %v593_v51  ;;  %v600_v31 = vshrl.u32 %v1222_v45, %v594_v3  ;;  %v603_v19 = vshrl.u32 %v1223_v47, %v594_v3 }
 0x107   : > { %v523_v13 = vsel %vm521_vm12, %v522_v29, %v1528_v8  ;;  %v599_v33 = vshll.u32 %v1221_v42, %v593_v51  ;;  %v602_v18 = vshll.u32 %v1222_v45, %v593_v51  ;;  %v605_v35 = vshll.u32 %v1223_v47, %v593_v51 }
 0x108   : > { %v412_v32 = vsub.s32 0, %v410_v27  ;;  %v524_v34 = vadd.s32 %v523_v13, %v519_v28  ;;  %v606_v36 = vshrl.u32 %v1224_v49, %v594_v3  ;;  %v609_v37 = vshrl.u32 %v1225_v56, %v594_v3 }
 0x109   : > { %v598_v43 = vor.u32 %v597_v7, %v596_v30  ;;  %v608_v44 = vshll.u32 %v1224_v49, %v593_v51  ;;  %v601_v48 = vor.u32 %v600_v31, %v599_v33  ;;  %v604_v50 = vor.u32 %v603_v19, %v602_v18 }
 0x10a   : > { %v958_v41 = vmin.u32 %v412_v32, %v410_v27  ;;  %v525_v46 = vadd.s32 536870912, %v524_v34  ;;  %v607_v52 = vor.u32 %v606_v36, %v605_v35  ;;  %v1557_v55 = vadd.f32 %v976_v39, %v688_v26 }
 0x10b   : > { %v610_v54 = vor.u32 %v609_v37, %v608_v44  ;;  %v402_v57 = vadd.s32 %v1497_v23, %v1494_v22  ;;  %vm614_vm13 = vcmp.lt.s32.totalorder %v1538_v25, 4  ;;  %v627_v59 = vshll.u32 %v587_v20, 8 }
 0x10c   : > { %v414_v53 = vclz %v958_v41  ;;  %v1561_v58 = vshrl.u32 %v525_v46, 30  ;;  %vm611_vm14 = vcmp.lt.s32.totalorder %v1538_v25, 1  ;;  %vm613_vm15 = vcmp.lt.s32.totalorder %v1538_v25, 3 }
 0x10d   : > { %v620_v51 = vsel %vm614_vm13, %v607_v52, 920167782  ;;  %v595_v62 = vshrl.u32 %v1220_v40, %v594_v3  ;;  %v619_v63 = vsel %vm611_vm14, %v598_v43, %v601_v48  ;;  %v616_v23 = vsel %vm614_vm13, %v604_v50, 2102212464 }
 0x10e   : > { %v959_v60 = vadd.s32 4294967294, %v414_v53  ;;  %v527_v61 = vshll.u32 %v1561_v58, 30  ;;  %v621_v22 = vsel %vm613_vm15, %v604_v50, %v620_v51  ;;  %v623_v0 = vsel %vm611_vm14, %v601_v48, %v604_v50 }
 0x10f   : > { %v624_v1 = vsel %vm614_vm13, %v610_v54, 1326507024  ;;  %vm612_vm1 = vcmp.lt.s32.totalorder %v1538_v25, 2  ;;  %v615_v11 = vsel %vm611_vm14, %v595_v62, %v598_v43  ;;  %v617_v26 = vsel %vm613_vm15, %v601_v48, %v616_v23 }
 0x110   : > { %vm960_vm0 = vcmp.lt.s32.totalorder %v959_v60, 0  ;;  %v528_v5 = vsub.s32 %v524_v34, %v527_v61  ;;  %v625_v8 = vsel %vm613_vm15, %v607_v52, %v624_v1  ;;  %v622_v15 = vsel %vm612_vm1, %v619_v63, %v621_v22 }
 0x111   : > { %v417_v2 = vsel %vm960_vm0, 0, %v959_v60  ;;  %v626_v28 = vsel %vm612_vm1, %v623_v0, %v625_v8  ;;  %v1588_v32 = vmul.u32.u64.low %v627_v59, %v622_v15  ;;  %v1589_v13 = vmul.u32.u64.high %v627_v59, %v622_v15, %v1588_v32 }
 0x112   : > { %v418_v3 = vsub.s32 32, %v417_v2  ;;  %v422_v9 = vsub.s32 4294967266, %v417_v2  ;;  %v419_v17 = vshll.u32 %v410_v27, %v417_v2  ;;  %v530_v20 = vsub.s32 0, %v528_v5 }
 0x113   : > { %v1585_v30 = vmul.u32.u64.low %v627_v59, %v626_v28  ;;  %v1586_v31 = vmul.u32.u64.high %v627_v59, %v626_v28, %v1585_v30  ;;  %v695_v27 = vand.u32 2139095040, %v1557_v55  ;;  %v618_v35 = vsel %vm612_vm1, %v615_v11, %v617_v26 }
 0x114   : > { %v420_v29 = vshrl.u32 %v402_v57, %v418_v3  ;;  %v423_v7 = vadd.s32 127, %v422_v9  ;;  %v965_v19 = vmin.u32 %v530_v20, %v528_v5  ;;  %v432_v37 = vsub.s32 4, %v1523_v4 }
 0x115   : > { %vm636_vm2 = vc.u32 %v1586_v31, %v1588_v32  ;;  %v637_v41 = vadd.s32 1, %v1589_v13  ;;  %v696_v43 = vshrl.u32 %v695_v27, 23  ;;  %v634_v48 = vmul.u32 %v627_v59, %v618_v35 }
 0x116   : > { %v421_v33 = vor.u32 %v420_v29, %v419_v17  ;;  %v424_v18 = vshll.u32 %v423_v7, 23  ;;  %v532_v34 = vclz %v965_v19  ;;  %vm348_vm3 = vcmp.lt.s32.totalorder %v1446_v10, 0 }
 0x117   : > { %v638_v50 = vsel %vm636_vm2, %v637_v41, %v1589_v13  ;;  %v977_v25 = vadd.s32 4294967169, %v696_v43  ;;  %v433_v53 = vsel %vm348_vm3, %v432_v37, %v1523_v4  ;;  %v520_v60 = vadd.s32 %v1527_v6, %v1535_v16 }
 0x118   : > { %v425_v36 = vor.u32 4788187, %v424_v18  ;;  %v966_v39 = vadd.s32 4294967294, %v532_v34  ;;  %v428_v46 = vcvt.s32.f32 %v421_v33  ;;  %v639_v57 = vadd.s32 %v638_v50, %v634_v48 }
 0x119   : > { %v702_v62 = vadd.s32 1, %v977_v25  ;;  %vm1608_vm5 = vcmp.le.f32.partialorder %v346_v14, 0.7853982  ;;  %vm466_vm7 = vcmp.lt.s32.totalorder %v1460_v21, 0  ;;  %v692_v30 = vand.u32 2147483647, %v1557_v55 }
 0x11a   : > { %v426_v44 = vand.u32 2147483647, %v425_v36  ;;  %vm967_vm4 = vcmp.lt.s32.totalorder %v966_v39, 0  ;;  %v640_v22 = vadd.s32 536870912, %v639_v57  ;;  %v435_v6 = vsel %vm1608_vm5, 0, %v433_v53 }
 0x11b   : > { %v535_v54 = vsel %vm967_vm4, 0, %v966_v39  ;;  %vm703_vm6 = vcmp.gt.s32.totalorder %v702_v62, 0  ;;  %v439_v15 = vadd.s32 3, %v435_v6  ;;  %vm1635_vm8 = vcmp.le.f32.partialorder %v464_v24, 0.7853982 }
 0x11c   : > { %v429_v52 = vmul.f32 %v428_v46, %v426_v44  ;;  %v536_v51 = vsub.s32 32, %v535_v54  ;;  %v540_v61 = vsub.s32 4294967266, %v535_v54  ;;  %v537_v23 = vshll.u32 %v528_v5, %v535_v54 }
 0x11d   : > { %v1616_v16 = vshrl.u32 %v640_v22, 30  ;;  %v704_v2 = vsel %vm703_vm6, %v702_v62, 0  ;;  %v550_v5 = vsub.s32 4, %v1561_v58  ;;  %v1631_v13 = vand.u32 3, %v439_v15 }
 0x11e   : > { %v430_v63 = vxor.u32 2147483648, %v429_v52  ;;  %v538_v0 = vshrl.u32 %v520_v60, %v536_v51  ;;  %v541_v1 = vadd.s32 127, %v540_v61  ;;  %v706_v11 = vand.u32 31, %v704_v2 }
 0x11f   : > { %v642_v9 = vshll.u32 %v1616_v16, 30  ;;  %v551_v7 = vsel %vm466_vm7, %v550_v5, %v1561_v58  ;;  %v699_v37 = vand.u32 8388607, %v692_v30  ;;  %v705_v43 = vshrl.u32 %v704_v2, 5 }
 0x120   : > { %v431_v4 = vsel %vm348_vm3, %v430_v63, %v429_v52  ;;  %v539_v8 = vor.u32 %v538_v0, %v537_v23  ;;  %v542_v3 = vshll.u32 %v541_v1, 23  ;;  %v707_v26 = vsub.s32 32, %v706_v11 }
 0x121   : > { %v434_v14 = vsel %vm1608_vm5, %v1446_v10, %v431_v4  ;;  %v1624_v20 = vsub.s32 %v639_v57, %v642_v9  ;;  %v553_v27 = vsel %vm1635_vm8, 0, %v551_v7  ;;  %v709_v44 = vshll.u32 %v1220_v40, %v706_v11 }
 0x122   : > { %1066 = vcosq.f32 %v434_v14  ;;  %v543_v17 = vor.u32 4788187, %v542_v3  ;;  %v546_v29 = vcvt.s32.f32 %v539_v8  ;;  %v710_v58 = vshrl.u32 %v1221_v42, %v707_v26 }
 0x123   : > { %1068 = vsinq.f32 %v434_v14  ;;  %v645_v19 = vsub.s32 0, %v1624_v20  ;;  %v713_v35 = vshrl.u32 %v1222_v45, %v707_v26  ;;  %v716_v39 = vshrl.u32 %v1223_v47, %v707_v26 }
 0x124   : > { %v544_v28 = vand.u32 2147483647, %v543_v17  ;;  %v719_v24 = vshrl.u32 %v1224_v49, %v707_v26  ;;  %v712_v46 = vshll.u32 %v1221_v42, %v706_v11  ;;  %v715_v50 = vshll.u32 %v1222_v45, %v706_v11 }
 0x125   : > { %v971_v34 = vmin.u32 %v645_v19, %v1624_v20  ;;  %v718_v25 = vshll.u32 %v1223_v47, %v706_v11  ;;  %v722_v52 = vshrl.u32 %v1225_v56, %v707_v26  ;;  %vm442_vm9 = vcmp.eq.s32.totalorder %v1631_v13, 0 }
 0x126   : > { %v547_v18 = vmul.f32 %v546_v29, %v544_v28  ;;  %v711_v57 = vor.u32 %v710_v58, %v709_v44  ;;  %v714_v60 = vor.u32 %v713_v35, %v712_v46  ;;  %v717_v42 = vor.u32 %v716_v39, %v715_v50  ;;  %v961_v46 = vld [vmem:[%s1417_s12 + $0x18] sm:$0xff] }
 0x127   : > { %v647_v41 = vclz %v971_v34  ;;  %v720_v61 = vor.u32 %v719_v24, %v718_v25  ;;  %v721_v62 = vshll.u32 %v1224_v49, %v706_v11  ;;  %vm445_vm10 = vcmp.eq.s32.totalorder %v1631_v13, 2 }
 0x128   : > { %v548_v36 = vxor.u32 2147483648, %v547_v18  ;;  %v557_v47 = vadd.s32 3, %v553_v27  ;;  %v700_v56 = vor.u32 8388608, %v699_v37  ;;  %v708_v59 = vshrl.u32 %v1220_v40, %v707_v26 }
 0x129   : > { %v972_v54 = vadd.s32 4294967294, %v647_v41  ;;  %v723_v63 = vor.u32 %v722_v52, %v721_v62  ;;  %vm724_vm12 = vcmp.lt.s32.totalorder %v705_v43, 1  ;;  %vm726_vm13 = vcmp.lt.s32.totalorder %v705_v43, 3 }
 0x12a   : > { %v549_v48 = vsel %vm466_vm7, %v548_v36, %v547_v18  ;;  %vm727_vm14 = vcmp.lt.s32.totalorder %v705_v43, 4  ;;  %v732_v23 = vsel %vm724_vm12, %v711_v57, %v714_v60  ;;  %v558_v49 = vand.u32 3, %v557_v47 }
 0x12b   : > { %v552_v53 = vsel %vm1635_vm8, %v1460_v21, %v549_v48  ;;  %vm973_vm11 = vcmp.lt.s32.totalorder %v972_v54, 0  ;;  %v729_v4 = vsel %vm727_vm14, %v717_v42, 2102212464  ;;  %v733_v6 = vsel %vm727_vm14, %v720_v61, 920167782 }
 0x12c   : > { %v1067_v51 = vpop.eup %1066  ;;  %1070 = vcosq.f32 %v552_v53  ;;  %v650_v1 = vsel %vm973_vm11, 0, %v972_v54  ;;  %vm725_vm15 = vcmp.lt.s32.totalorder %v705_v43, 2  ;;  %v734_v2 = vsel %vm726_vm13, %v717_v42, %v733_v6 }
 0x12d   : > { %v1069_v45 = vpop.eup %1068  ;;  %1072 = vsinq.f32 %v552_v53  ;;  %v446_v22 = vxor.u32 2147483648, %v1067_v51  ;;  %v736_v14 = vsel %vm724_vm12, %v714_v60, %v717_v42  ;;  %v728_v8 = vsel %vm724_vm12, %v708_v59, %v711_v57 }
 0x12e   : > { %v443_v0 = vxor.u32 2147483648, %v1069_v45  ;;  %v735_v3 = vsel %vm725_vm15, %v732_v23, %v734_v2  ;;  %v737_v5 = vsel %vm727_vm14, %v723_v63, 1326507024  ;;  %v740_v40 = vshll.u32 %v700_v56, 8 }
 0x12f   : > { %v447_v9 = vsel %vm445_vm10, %v446_v22, %v1069_v45  ;;  %v655_v11 = vsub.s32 4294967266, %v650_v1  ;;  %v730_v15 = vsel %vm726_vm13, %v714_v60, %v729_v4  ;;  %v738_v17 = vsel %vm726_vm13, %v720_v61, %v737_v5  ;;  %v570_v61 = vld [vmem:[%s323_s14] sm:$0xff] }
 0x130   : > { %v444_v26 = vsel %vm442_vm9, %v1067_v51, %v443_v0  ;;  %v739_v28 = vsel %vm725_vm15, %v736_v14, %v738_v17  ;;  %v1671_v29 = vmul.u32.u64.low %v740_v40, %v735_v3  ;;  %v1672_v7 = vmul.u32.u64.high %v740_v40, %v735_v3, %v1671_v29 }
 0x131   : > { %v1674_v19 = vmul.u32.u64.low %v740_v40, %v739_v28  ;;  %v1675_v33 = vmul.u32.u64.high %v740_v40, %v739_v28, %v1674_v19  ;;  %vm438_vm0 = vweird.f32 %v1446_v10  ;;  %vm441_vm1 = vcmp.lt.s32.totalorder %v1631_v13, 2  ;;  %v334_v13 = vld [vmem:[%s1417_s12] sm:$0xff]  ;;  %s319_s12 = scalar_lea.vmem [#allocation7], %s951_s9 }
 0x132   : > { %v731_v27 = vsel %vm725_vm15, %v728_v8, %v730_v15  ;;  %v448_v58 = vsel %vm441_vm1, %v444_v26, %v447_v9  ;;  %vm556_vm2 = vweird.f32 %v1460_v21  ;;  %v656_v36 = vadd.s32 127, %v655_v11  ;;  %s816_s0 = sshll.u32 %s319_s12, 4  ;;  %s1734_s0 = int_to_ptr.vmem [resolvable:$true] %s816_s0 }
 0x133   : > { %vm560_vm3 = vcmp.eq.s32.totalorder %v558_v49, 0  ;;  %vm563_vm4 = vcmp.eq.s32.totalorder %v558_v49, 2  ;;  %v750_v39 = vadd.s32 1, %v1672_v7  ;;  %v651_v41 = vsub.s32 32, %v650_v1  ;;  %s1142_s17 = scalar_lea.vmem %s1734_s0, 64  ;;  %p1149_p8 = scmp.lt.s32.totalorder %s1734_s0, %s1147_s28 }
 0x134   : > { %v747_v44 = vmul.u32 %v740_v40, %v731_v27  ;;  %vm749_vm5 = vc.u32 %v1675_v33, %v1671_v29  ;;  %v449_v43 = vsel %vm438_vm0, nan, %v448_v58  ;;  %vm559_vm6 = vcmp.lt.s32.totalorder %v558_v49, 2  ;;  %p1143_p2 = scmp.ne.s32.totalorder %s1734_s0, %s1142_s17  ;;  %p1150_p9 = scmp.lt.s32.totalorder %s1148_s11, %s1142_s17 }
 0x135   : > { %v751_v50 = vsel %vm749_vm5, %v750_v39, %v1672_v7  ;;  %v635_v52 = vadd.s32 %v1588_v32, %v1586_v31  ;;  %v657_v53 = vshll.u32 %v656_v36, 23  ;;  %v450_v10 = vmul.f32 %v449_v43, %v334_v13 }
 0x136   : > { %v1071_v18 = vpop.eup %1070  ;;  %v752_v54 = vadd.s32 %v751_v50, %v747_v44  ;;  %v652_v45 = vshll.u32 %v1624_v20, %v650_v1  ;;  %vm581_vm8 = vcmp.lt.s32.totalorder %v1449_v12, 0  ;;  %v748_v1 = vadd.s32 %v1671_v29, %v1675_v33  ;;  %p1144_p10 = pnand %p1143_p2, %p1801_p12  ;;  %p1151_p11 = por %p1150_p9, %p1149_p8 }
 0x137   : > { %v1073_v34 = vpop.eup %1072  ;;  %v564_v35 = vxor.u32 2147483648, %v1071_v18  ;;  %v653_v51 = vshrl.u32 %v635_v52, %v651_v41  ;;  %v658_v47 = vor.u32 4788187, %v657_v53  ;;  %vm1705_vm9 = vcmp.le.f32.partialorder %v579_v38, 0.7853982 }
 0x138   : > { %v561_v37 = vxor.u32 2147483648, %v1073_v34  ;;  %v753_v42 = vadd.s32 536870912, %v752_v54  ;;  %v665_v28 = vsub.s32 4, %v1616_v16  ;;  %vm694_vm10 = vcmp.lt.s32.totalorder %v1557_v55, 0  ;;  %p1145_p7 = pneg %p1144_p10 }
 0x139   : > { %v565_v24 = vsel %vm563_vm4, %v564_v35, %v1073_v34  ;;  %v654_v63 = vor.u32 %v653_v51, %v652_v45  ;;  %v659_v31 = vand.u32 2147483647, %v658_v47  ;;  %vm693_vm11 = vcmp.le.f32.partialorder %v692_v30, 0.7853982  ;;  %v974_v51 = vld [vmem:[%s1424_s6 + $0x18] sm:$0xff] }
 0x13a   : > { %v562_v48 = vsel %vm560_vm3, %v1071_v18, %v561_v37  ;;  %v754_v56 = vshrl.u32 %v753_v42, 30  ;;  %v666_v38 = vsel %vm581_vm8, %v665_v28, %v1616_v16  ;;  %vm671_vm0 = vweird.f32 %v1449_v12  ;;  %p1152_p0 = pnand %p1151_p11, %p1145_p7 }
 0x13b   : > { %v566_v25 = vsel %vm559_vm6, %v562_v48, %v565_v24  ;;  %v661_v23 = vcvt.s32.f32 %v654_v63  ;;  %v668_v27 = vsel %vm1705_vm9, 0, %v666_v38  ;;  %vm784_vm3 = vweird.f32 %v1557_v55 }
 0x13c   : > { %v567_v57 = vsel %vm556_vm2, nan, %v566_v25  ;;  %v755_v22 = vshll.u32 %v754_v56, 30  ;;  %v778_v18 = vsub.s32 4, %v754_v56  ;;  %v672_v36 = vadd.s32 3, %v668_v27 }
 0x13d   : > { %v568_v60 = vmul.f32 %v961_v46, %v567_v57  ;;  %v662_v21 = vmul.f32 %v661_v23, %v659_v31  ;;  %vm800_vm4 = vcmask 257024  }
 0x13e   : > { %v756_v32 = vsub.s32 %v752_v54, %v755_v22  ;;  %v779_v35 = vsel %vm694_vm10, %v778_v18, %v754_v56  ;;  %v673_v41 = vand.u32 3, %v672_v36 }
 0x13f   : > { %v569_v62 = vadd.f32 %v568_v60, %v450_v10  ;;  %v663_v49 = vxor.u32 2147483648, %v662_v21  ;;  %v781_v16 = vsel %vm693_vm11, 0, %v779_v35  ;;  %v572_v10 = vld [vmem:[%s1424_s6] sm:$0xff] }
 0x140   : > { %v758_v0 = vsub.s32 0, %v756_v32  ;;  %v785_v43 = vadd.s32 3, %v781_v16  ;;  %vm675_vm12 = vcmp.eq.s32.totalorder %v673_v41, 0  ;;  %vm678_vm13 = vcmp.eq.s32.totalorder %v673_v41, 2 }
 0x141   : > { %v1697_v59 = vmul.f32 %v570_v61, %v569_v62  ;;  %v664_v20 = vsel %vm581_vm8, %v663_v49, %v662_v21  ;;  %vm674_vm14 = vcmp.lt.s32.totalorder %v673_v41, 2 }
 0x142   : > { %v978_v4 = vmin.u32 %v758_v0, %v756_v32  ;;  %v667_v15 = vsel %vm1705_vm9, %v1449_v12, %v664_v20  ;;  %v786_v48 = vand.u32 3, %v785_v43 }
 0x143   : > { %1074 = vcosq.f32 %v667_v15 }
 0x144   : > { %v760_v6 = vclz %v978_v4  ;;  %1076 = vsinq.f32 %v667_v15  ;;  %vm791_vm15 = vcmp.eq.s32.totalorder %v786_v48, 2  ;;  %vm788_vm1 = vcmp.eq.s32.totalorder %v786_v48, 0 }
 0x145   : > { %vm787_vm2 = vcmp.lt.s32.totalorder %v786_v48, 2 }
 0x146   : > { %v979_v2 = vadd.s32 4294967294, %v760_v6 }
 0x148   : > { %vm980_vm7 = vcmp.lt.s32.totalorder %v979_v2, 0 }
 0x149   : > { %v763_v14 = vsel %vm980_vm7, 0, %v979_v2 }
 0x14a   : > { %v764_v8 = vsub.s32 32, %v763_v14  ;;  %v768_v3 = vsub.s32 4294967266, %v763_v14  ;;  %v765_v40 = vshll.u32 %v756_v32, %v763_v14 }
 0x14c   : > { %v766_v9 = vshrl.u32 %v748_v1, %v764_v8  ;;  %v769_v11 = vadd.s32 127, %v768_v3 }
 0x14d   : > { %v1075_v39 = vpop.eup %1074 }
 0x14e   : > { %v767_v17 = vor.u32 %v766_v9, %v765_v40  ;;  %v770_v26 = vshll.u32 %v769_v11, 23  ;;  %v1077_v24 = vpop.eup %1076  ;;  %v679_v13 = vxor.u32 2147483648, %v1075_v39 }
 0x14f   : > { %v676_v44 = vxor.u32 2147483648, %v1077_v24 }
 0x150   : > { %v771_v29 = vor.u32 4788187, %v770_v26  ;;  %v774_v19 = vcvt.s32.f32 %v767_v17  ;;  %v680_v30 = vsel %vm678_vm13, %v679_v13, %v1077_v24 }
 0x151   : > { %v677_v46 = vsel %vm675_vm12, %v1075_v39, %v676_v44 }
 0x152   : > { %v772_v7 = vand.u32 2147483647, %v771_v29  ;;  %v681_v52 = vsel %vm674_vm14, %v677_v46, %v680_v30 }
 0x153   : > { %v682_v60 = vsel %vm671_vm0, nan, %v681_v52 }
 0x154   : > { %v775_v33 = vmul.f32 %v774_v19, %v772_v7  ;;  %v683_v45 = vmul.f32 %v682_v60, %v572_v10 }
 0x156   : > { %v776_v34 = vxor.u32 2147483648, %v775_v33 }
 0x158   : > { %v777_v58 = vsel %vm694_vm10, %v776_v34, %v775_v33 }
 0x159   : > { %v780_v37 = vsel %vm693_vm11, %v1557_v55, %v777_v58 }
 0x15a   : > { %1078 = vcosq.f32 %v780_v37 }
 0x15b   : > { %1080 = vsinq.f32 %v780_v37 }
 0x164   : > { %v1079_v50 = vpop.eup %1078 }
 0x165   : > { %v1081_v25 = vpop.eup %1080  ;;  %v792_v53 = vxor.u32 2147483648, %v1079_v50 }
 0x166   : > { %v789_v54 = vxor.u32 2147483648, %v1081_v25 }
 0x167   : > { %v793_v57 = vsel %vm791_vm15, %v792_v53, %v1081_v25 }
 0x168   : > { %v790_v42 = vsel %vm788_vm1, %v1079_v50, %v789_v54 }
 0x169   : > { %v794_v61 = vsel %vm787_vm2, %v790_v42, %v793_v57 }
 0x16a   : > { %v795_v62 = vsel %vm784_vm3, nan, %v794_v61 }
 0x16b   : > { %v796_v47 = vmul.f32 %v974_v51, %v795_v62 }
 0x16d   : > { %v797_v56 = vadd.f32 %v796_v47, %v683_v45 }
 0x16f   : > { %v798_v12 = vmul.f32 %v797_v56, %v1697_v59 }
 0x171   : > { %v799_v63 = vpack.c.bf16 %v798_v12, %v798_v12 }
 0x173   : > { %801 = vst.msk [vmem:[%s319_s12] sm:$0xf] %vm800_vm4, %v799_v63 }
 0x174   : > { %1155 = shalt.err (!%p1152_p0)
}
 0x175   : > { %s1156_s15 = scalar_lea.hbm %s1732_s26, 64  ;;  %s1160_s7 = scalar_lea.hbm %s1781_s5, 128 }
 0x176   : > { %p1157_p4 = scmp.ne.s32.totalorder %s1732_s26, %s1156_s15  ;;  %p1161_p5 = scmp.lt.u32.totalorder %s1732_s26, %s1781_s5 }
 0x177   : > { %p1162_p6 = scmp.lt.u32.totalorder %s1160_s7, %s1156_s15  ;;  %p1164_p2 = scmp.lt.u32.totalorder %s1156_s15, %s1732_s26 }
 0x178   : > { %p1158_p1 = pnand %p1157_p4, %p1801_p12 }
 0x179   : > { %p1163_p13 = por %p1162_p6, %p1161_p5 }
 0x17a   : > { %p1159_p3 = pneg %p1158_p1 }
 0x17b   : > { %p1165_p10 = por %p1164_p2, %p1163_p13 }
 0x17d   : > { %p1166_p7 = pnand %p1165_p10, %p1159_p3 }
 0x17f   : > { %1169 = shalt.err (!%p1166_p7)
}
 0x180   : > { %1008 = dma.vmem_to_hbm [thread:$0]  (%p1801_p12), %s1734_s0, 64, %s1732_s26, %s803_s13  }
 0x181 PF: > { %s828_s9 = sand.u32 1, %s1200_s18   ;;  %p1802_p8 = scmp.ne.s32.totalorder %s1788_s30, 0 }
 0x182   : > { %p1803_p9 = scmp.ge.s32.totalorder %s1212_s21, 2  ;;  %s829_s10 = scalar_lea.sflag [#allocation4], %s828_s9 }
 0x184   : > { %p1018_p11 = pnand %p1803_p9, %p1802_p8 }
 0x186   : > { %1195 = dma.done.wait (!%p1018_p11), %s829_s10, 64  }
 0x187   : > { %1197 = vsyncadd (!%p1018_p11), %s829_s10, 4294967232  ;;  %p21_p0 = scmp.ge.s32.totalorder %s1282_s24, 4   ;;  %s1804_s18 = smov %s1204_s19 }
 0x188   : > { %s1805_s19 = smov %s1208_s20  ;;  %s1806_s20 = smov %s1294_s27 }
 0x189   : > { %s1807_s21 = smov %s1282_s24  ;;  %23 = sbr.rel (!%p21_p0) target bundleno = 9 (0x9), region = 117 }
 0x190   :  { %834 = vsyncpa [#allocation3], 1 }
 0x191   :  { %836 = vsyncpa [#allocation3 + $0x1], 1 }
 0x192   :  { %837 = vsyncpa [#allocation6], 1 }
 0x193   :  { %839 = vsyncpa [#allocation6 + $0x1], 1 }
 0x194   :  { %840 = vsyncpa [#allocation4], 1 }
 0x195   :  { %842 = vsyncpa [#allocation4 + $0x1], 1 }

</bundles_post_ra>
